<compile_context>
chip_gen: v5e
topology: v5e:2x2
jax: 0.10.0
libtpu: 0.0.40
codegen_flags: <defaults>
</compile_context>

<pallas_src>
import functools

import jax
import jax.numpy as jnp
from jax import lax
from jax.experimental import pallas as pl
from jax.experimental.pallas import tpu as pltpu

# VICRegLoss default hyper-parameters (from __init__).
MIN_VAR = 1.0
EPS = 1e-4
LAM = 25.0
MU = 25.0
NU = 0.1
ALPHA = 0.9  # VICRegLocalLoss weighting of the global terms.


# --------------------------------------------------------------------------
# Stage 1: stream (B, C, S) in its native layout and accumulate per-chunk
# spatial sums.  Grid = (n_chunks, tiles_per_chunk); leading axis is
# "parallel" (megacore on v7x), trailing axis is the S reduction.
# --------------------------------------------------------------------------
def _sum_kernel(x1_ref, x2_ref, s1_ref, s2_ref, *,
                n_spatial, s_tile, tiles_per_chunk):
    p = pl.program_id(0)   # chunk (parallel)
    t = pl.program_id(1)   # tile within chunk (reduction)

    @pl.when(t == 0)
    def _init():
        s1_ref[...] = jnp.zeros_like(s1_ref)
        s2_ref[...] = jnp.zeros_like(s2_ref)

    # Mask the ragged / duplicated tail tile in-kernel (no HBM padding pass).
    start = (p * tiles_per_chunk + t) * s_tile
    lane = lax.broadcasted_iota(jnp.int32, x1_ref.shape, 2)
    valid = (start + lane) < n_spatial

    x1 = jnp.where(valid, x1_ref[...].astype(jnp.float32), 0.0)
    x2 = jnp.where(valid, x2_ref[...].astype(jnp.float32), 0.0)

    # Cross-lane (XLU) reduce over the S tile -> (B, C); fully hidden under
    # the DMA bottleneck, so no need for lane-partial accumulators.
    s1_ref[...] += jnp.sum(x1, axis=-1)[None]
    s2_ref[...] += jnp.sum(x2, axis=-1)[None]


# --------------------------------------------------------------------------
# Stage 2: tiny epilogue — combine per-chunk sums, compute inv/var/cov.
# --------------------------------------------------------------------------
def _epilogue_kernel(s1_ref, s2_ref, out_ref, *,
                     n_spatial, lam, mu, nu, min_var, eps):
    inv_s = 1.0 / float(n_spatial)
    f1 = jnp.sum(s1_ref[...], axis=0) * inv_s      # (B, C) spatial means, f32
    f2 = jnp.sum(s2_ref[...], axis=0) * inv_s
    B, C = f1.shape

    # Invariance: sum((f1 - f2)^2) / numel.
    inv = jnp.sum((f1 - f2) ** 2) * (1.0 / (B * C))

    # Matches torch.var(X, 0) (unbiased).  B == 1 -> nan, like torch.
    denom = (1.0 / (B - 1)) if B > 1 else float("nan")

    def var_and_cov(f):
        mean = jnp.mean(f, axis=0, keepdims=True)
        fc = f - mean                                      # centered (B, C)
        col_sq = jnp.sum(fc * fc, axis=0, keepdims=True)   # (1, C)

        # Variance hinge.
        std = jnp.sqrt(col_sq * denom + eps)
        v_loss = jnp.mean(jnp.maximum(min_var - std, 0.0))

        # sum(off_diag(cov)^2) = (||fc^T fc||_F^2 - sum(diag^2)) / (B-1)^2.
        # When B <= C use the B x B Gram matrix (same Frobenius value, tiny
        # intermediate); clamp at 0 against f32 cancellation.
        if B <= C:
            g = lax.dot_general(fc, fc, (((1,), (1,)), ((), ())),
                                preferred_element_type=jnp.float32)
        else:
            g = lax.dot_general(fc, fc, (((0,), (0,)), ((), ())),
                                preferred_element_type=jnp.float32)
        frob = jnp.sum(g * g)
        off_sq = jnp.maximum(frob - jnp.sum(col_sq * col_sq), 0.0)
        off_sq = off_sq * (denom * denom)
        c_loss = off_sq * (1.0 / C)        # (off / sqrt(C))^2 summed
        return v_loss, c_loss

    v1, c1 = var_and_cov(f1)
    v2, c2 = var_and_cov(f2)

    out_ref[0] = lam * inv
    out_ref[1] = mu * (0.5 * v1 + 0.5 * v2)
    out_ref[2] = nu * (0.5 * c1 + 0.5 * c2)


# --------------------------------------------------------------------------
# Planning helpers (generation-aware VMEM budgeting).
# --------------------------------------------------------------------------
def _vmem_capacity_bytes():
    try:
        return int(pltpu.get_tpu_info().vmem_capacity_bytes)
    except Exception:
        return 64 * 1024 * 1024   # v7x lower bound -> safe on every generation


def _padded_sublanes(c, itemsize):
    pack = max(1, 4 // max(1, itemsize))   # values per 32-bit word (sublane pack)
    mult = 8 * pack
    return -(-c // mult) * mult


def _plan(B, C, S, itemsize, s_tile):
    """Pick the S-tile, chunking and vmem_limit from the chip's VMEM size."""
    vmem_cap = _vmem_capacity_bytes()
    c_pad = _padded_sublanes(C, itemsize)
    bytes_per_s = max(1, B * c_pad * itemsize)

    # Reserve space for the two double-buffered (1, B, C) f32 output blocks.
    out_block_bytes = (-(-B // 8) * 8) * max(128, -(-C // 128) * 128) * 4
    reserve = 2 * 2 * out_block_bytes + (2 << 20)

    usable = max(4 << 20, vmem_cap // 2 - reserve)
    per_block_budget = max(256 * 1024, usable // 4)   # 2 inputs x 2 buffers

    if s_tile is None:
        tile = max(128, (per_block_budget // bytes_per_s) // 128 * 128)
    else:
        tile = max(128, (int(s_tile) // 128) * 128)
    if tile >= S:
        tile = S            # single full-extent block (always a legal shape)

    num_tiles = -(-S // tile)
    n_chunks = 2 if num_tiles >= 2 else 1          # dual-TC on v7x, harmless elsewhere
    tiles_per_chunk = -(-num_tiles // n_chunks)

    block_bytes = B * c_pad * tile * itemsize
    need = 4 * block_bytes + reserve
    vmem_limit = int(min(vmem_cap, max(need, 32 << 20)))
    return tile, num_tiles, n_chunks, tiles_per_chunk, vmem_limit


def _make_in_index_map(tiles_per_chunk, last_tile):
    def index_map(p, t):
        g = p * tiles_per_chunk + t
        # Clamp so a padded trailing grid step never addresses a block whose
        # start lies past the array; its contribution is masked to zero.
        return (0, 0, jnp.minimum(g, last_tile))
    return index_map


def _epilogue_call(sums1, sums2, *, n_spatial):
    P, B, C = sums1.shape
    kernel = functools.partial(
        _epilogue_kernel, n_spatial=n_spatial, lam=LAM, mu=MU, nu=NU,
        min_var=MIN_VAR, eps=EPS)

    vmem_cap = _vmem_capacity_bytes()
    need = (4 * P * B * C + 8 * B * C + 2 * min(B, C) ** 2) * 4 + (4 << 20)
    vmem_limit = int(min(vmem_cap, max(need, 32 << 20)))

    out = pl.pallas_call(
        kernel,
        out_shape=jax.ShapeDtypeStruct((3,), jnp.float32),
        grid_spec=pltpu.PrefetchScalarGridSpec(
            num_scalar_prefetch=0,
            grid=(1,),
            in_specs=[
                pl.BlockSpec((P, B, C), lambda i: (0, 0, 0)),
                pl.BlockSpec((P, B, C), lambda i: (0, 0, 0)),
            ],
            out_specs=pl.BlockSpec(memory_space=pltpu.MemorySpace.SMEM),
        ),
        compiler_params=pltpu.CompilerParams(
            dimension_semantics=("arbitrary",),
            vmem_limit_bytes=vmem_limit),
    )(sums1, sums2)
    return out[0], out[1], out[2]


# --------------------------------------------------------------------------
# Public entry points.
# --------------------------------------------------------------------------
def vicreg_loss_pallas(X1, X2, *, s_tile=None):
    """Pallas implementation of VICRegLoss.forward.

    Accepts (B, C, H, W, (D)) or (B, C) inputs in any float dtype (streamed
    in that dtype, accumulated in float32).  Returns
    (lam * inv_loss, mu * var_loss, nu * cov_loss) as float32 scalars.
    """
    if X1.shape != X2.shape:
        raise ValueError("X1 and X2 must have the same shape")
    if X1.ndim < 2:
        raise ValueError("inputs must be at least 2-D (B, C, ...)")

    B, C = X1.shape[:2]

    if X1.ndim == 2:
        # Already-flat (B, C) features: the spatial mean is a no-op, run only
        # the tiny epilogue kernel.
        sums1 = X1.astype(jnp.float32)[None]
        sums2 = X2.astype(jnp.float32)[None]
        return _epilogue_call(sums1, sums2, n_spatial=1)

    # Native layout: (B, C, H, W, (D)) -> (B, C, S).  Pure trailing-dim
    # collapse (no transpose, no pad, no extra HBM pass).
    X1 = X1.reshape(B, C, -1)
    X2 = X2.reshape(B, C, -1)
    S = X1.shape[-1]
    if S == 0:
        raise ValueError("spatial size must be non-zero")
    itemsize = jnp.dtype(X1.dtype).itemsize

    tile, num_tiles, n_chunks, tiles_per_chunk, vmem_limit = _plan(
        B, C, S, itemsize, s_tile)

    in_map = _make_in_index_map(tiles_per_chunk, num_tiles - 1)
    kernel = functools.partial(
        _sum_kernel, n_spatial=S, s_tile=tile, tiles_per_chunk=tiles_per_chunk)

    cost = pl.CostEstimate(
        flops=6 * B * C * S,
        transcendentals=0,
        bytes_accessed=2 * B * C * S * itemsize + 2 * n_chunks * B * C * 4)

    sums1, sums2 = pl.pallas_call(
        kernel,
        out_shape=(jax.ShapeDtypeStruct((n_chunks, B, C), jnp.float32),
                   jax.ShapeDtypeStruct((n_chunks, B, C), jnp.float32)),
        grid_spec=pltpu.PrefetchScalarGridSpec(
            num_scalar_prefetch=0,
            grid=(n_chunks, tiles_per_chunk),
            in_specs=[
                pl.BlockSpec((B, C, tile), in_map),
                pl.BlockSpec((B, C, tile), in_map),
            ],
            out_specs=[
                pl.BlockSpec((1, B, C), lambda p, t: (p, 0, 0)),
                pl.BlockSpec((1, B, C), lambda p, t: (p, 0, 0)),
            ],
        ),
        compiler_params=pltpu.CompilerParams(
            dimension_semantics=("parallel", "arbitrary"),
            vmem_limit_bytes=vmem_limit),
        cost_estimate=cost,
    )(X1, X2)

    return _epilogue_call(sums1, sums2, n_spatial=S)


def vicreg_local_global_terms(X1, X2, *, alpha=ALPHA, s_tile=None):
    """Global terms of VICRegLocalLoss.forward (lam*inv*a, mu*var*a, nu*cov*a)."""
    inv_w, var_w, cov_w = vicreg_loss_pallas(X1, X2, s_tile=s_tile)
    # TODO(synk): VICRegLocalLoss.local_loss (torch.cdist + topk + unravel_index
    # dynamic gathers over bounding boxes) has no clean single-kernel Pallas
    # mapping here; only the global VICReg terms are computed on-device.
    return inv_w * alpha, var_w * alpha, cov_w * alpha


# --------------------------------------------------------------------------
# Pure-JAX reference (matches the PyTorch VICRegLoss.forward semantics).
# --------------------------------------------------------------------------
def _vicreg_loss_ref(X1, X2):
    def flat(x):
        if x.ndim > 2:
            return x.reshape(x.shape[0], x.shape[1], -1).mean(-1)
        return x

    f1, f2 = flat(X1).astype(jnp.float32), flat(X2).astype(jnp.float32)
    B, C = f1.shape

    def var_loss(f):
        std = jnp.sqrt(jnp.var(f, axis=0, ddof=1) + EPS)
        return jnp.mean(jax.nn.relu(MIN_VAR - std))

    def cov_loss(f):
        fc = f - f.mean(0)
        cov = fc.T @ fc / (B - 1)
        off = cov - jnp.diag(jnp.diag(cov))
        return jnp.sum((off / jnp.sqrt(C)) ** 2)

    inv = jnp.sum((f1 - f2) ** 2 / (B * C))
    var = var_loss(f1) / 2 + var_loss(f2) / 2
    cov = cov_loss(f1) / 2 + cov_loss(f2) / 2
    return LAM * inv, MU * var, NU * cov


if __name__ == "__main__":
    key = jax.random.PRNGKey(0)
    k1, k2, k3, k4 = jax.random.split(key, 4)

    # (B, C, H, W) inputs as in the PyTorch module docstring.
    X1 = jax.random.normal(k1, (2, 4, 16, 16), dtype=jnp.float32)
    X2 = X1 + 0.1 * jax.random.normal(k2, (2, 4, 16, 16), dtype=jnp.float32)

    out = jax.block_until_ready(vicreg_loss_pallas(X1, X2))
    ref = jax.block_until_ready(_vicreg_loss_ref(X1, X2))
    for o, r in zip(out, ref):
        assert jnp.allclose(o, r, rtol=1e-4, atol=1e-5), (o, r)

    # Ragged-S path (S=144, tile=128 -> 2 chunks, masked tail) with bf16 in
    # HBM / f32 accumulation.
    Y1 = jax.random.normal(k3, (3, 8, 12, 12), dtype=jnp.float32)
    Y2 = Y1 + 0.1 * jax.random.normal(k4, (3, 8, 12, 12), dtype=jnp.float32)
    Y1b, Y2b = Y1.astype(jnp.bfloat16), Y2.astype(jnp.bfloat16)
    out_bf = jax.block_until_ready(vicreg_loss_pallas(Y1b, Y2b, s_tile=128))
    ref_bf = jax.block_until_ready(
        _vicreg_loss_ref(Y1b.astype(jnp.float32), Y2b.astype(jnp.float32)))
    for o, r in zip(out_bf, ref_bf):
        assert jnp.allclose(o, r, rtol=5e-3, atol=1e-4), (o, r)

    # Multi-step streamed accumulation per chunk (S=1024, tile=128 -> grid (2,4)).
    k5, k6 = jax.random.split(k3)
    Z1 = jax.random.normal(k5, (2, 4, 32, 32), dtype=jnp.float32)
    Z2 = Z1 + 0.1 * jax.random.normal(k6, (2, 4, 32, 32), dtype=jnp.float32)
    out_z = jax.block_until_ready(vicreg_loss_pallas(Z1, Z2, s_tile=128))
    ref_z = jax.block_until_ready(_vicreg_loss_ref(Z1, Z2))
    for o, r in zip(out_z, ref_z):
        assert jnp.allclose(o, r, rtol=1e-4, atol=1e-5), (o, r)

    # Already-flat (B, C) feature path (epilogue-only).
    k7, k8 = jax.random.split(k5)
    F1 = jax.random.normal(k7, (4, 8), dtype=jnp.float32)
    F2 = F1 + 0.1 * jax.random.normal(k8, (4, 8), dtype=jnp.float32)
    out_f = jax.block_until_ready(vicreg_loss_pallas(F1, F2))
    ref_f = jax.block_until_ready(_vicreg_loss_ref(F1, F2))
    for o, r in zip(out_f, ref_f):
        assert jnp.allclose(o, r, rtol=1e-4, atol=1e-5), (o, r)

    # Global terms of the VICRegLocalLoss forward (scaled by alpha).
    loc = jax.block_until_ready(vicreg_local_global_terms(X1, X2))
    for o, r in zip(loc, ref):
        assert jnp.allclose(o, ALPHA * r, rtol=1e-4, atol=1e-5), (o, r)

    print("KERNEL_OK")
</pallas_src>

<mosaic_0001>
module attributes {stable_mosaic.version = 11 : i64} {
  func.func @_sum_kernel(%arg0: i32, %arg1: i32, %arg2: memref<2x4x256xf32, #tpu.memory_space<vmem>>, %arg3: memref<2x4x256xf32, #tpu.memory_space<vmem>>, %arg4: memref<1x2x4xf32, #tpu.memory_space<vmem>>, %arg5: memref<1x2x4xf32, #tpu.memory_space<vmem>>) attributes {dimension_semantics = [#tpu.dimension_semantics<parallel>, #tpu.dimension_semantics<arbitrary>], iteration_bounds = array<i64: 1, 1>, scalar_prefetch = 0 : i64, scratch_operands = 0 : i64, tpu.core_type = #tpu.core_type<tc>, window_params = [{transform_indices = @transform_0, window_bounds = array<i64: 2, 4, 256>}, {transform_indices = @transform_1, window_bounds = array<i64: 2, 4, 256>}, {transform_indices = @transform_2, window_bounds = array<i64: 1, 2, 4>}, {transform_indices = @transform_3, window_bounds = array<i64: 1, 2, 4>}]} {
    %c0_i32 = arith.constant 0 : i32
    %0 = arith.cmpi eq, %arg1, %c0_i32 : i32
    %1 = arith.extui %0 : i1 to i32
    %c0_i32_0 = arith.constant 0 : i32
    %2 = arith.cmpi ne, %1, %c0_i32_0 : i32
    scf.if %2 {
      %cst_22 = arith.constant 0.000000e+00 : f32
      %27 = vector.broadcast %cst_22 : f32 to vector<1x2x4xf32>
      %c0_23 = arith.constant 0 : index
      %c0_24 = arith.constant 0 : index
      %c0_25 = arith.constant 0 : index
      %28 = vector.load %arg4[%c0_23, %c0_24, %c0_25] : memref<1x2x4xf32, #tpu.memory_space<vmem>>, vector<1x2x4xf32>
      tpu.vector_store %arg4[%c0_23, %c0_24, %c0_25], %27 {strides = array<i32>} : memref<1x2x4xf32, #tpu.memory_space<vmem>>, vector<1x2x4xf32>,
      %cst_26 = arith.constant 0.000000e+00 : f32
      %29 = vector.broadcast %cst_26 : f32 to vector<1x2x4xf32>
      %c0_27 = arith.constant 0 : index
      %c0_28 = arith.constant 0 : index
      %c0_29 = arith.constant 0 : index
      %30 = vector.load %arg5[%c0_27, %c0_28, %c0_29] : memref<1x2x4xf32, #tpu.memory_space<vmem>>, vector<1x2x4xf32>
      tpu.vector_store %arg5[%c0_27, %c0_28, %c0_29], %29 {strides = array<i32>} : memref<1x2x4xf32, #tpu.memory_space<vmem>>, vector<1x2x4xf32>,
    } else {
    }
    %c1_i32 = arith.constant 1 : i32
    %3 = arith.muli %arg0, %c1_i32 : i32
    %4 = arith.addi %3, %arg1 : i32
    %c256_i32 = arith.constant 256 : i32
    %5 = arith.muli %4, %c256_i32 : i32
    %6 = tpu.iota {dimensions = array<i32: 2>} : vector<2x4x256xi32>
    %7 = vector.broadcast %5 : i32 to vector<2x4x256xi32>
    %8 = arith.addi %7, %6 : vector<2x4x256xi32>
    %c256_i32_1 = arith.constant 256 : i32
    %9 = vector.broadcast %c256_i32_1 : i32 to vector<2x4x256xi32>
    %10 = arith.cmpi slt, %8, %9 : vector<2x4x256xi32>
    %c0 = arith.constant 0 : index
    %c0_2 = arith.constant 0 : index
    %c0_3 = arith.constant 0 : index
    %11 = vector.load %arg2[%c0, %c0_2, %c0_3] : memref<2x4x256xf32, #tpu.memory_space<vmem>>, vector<2x4x256xf32>
    %cst = arith.constant 0.000000e+00 : f32
    %12 = vector.broadcast %cst : f32 to vector<2x4x256xf32>
    %13 = arith.select %10, %11, %12 : vector<2x4x256xi1>, vector<2x4x256xf32>
    %c0_4 = arith.constant 0 : index
    %c0_5 = arith.constant 0 : index
    %c0_6 = arith.constant 0 : index
    %14 = vector.load %arg3[%c0_4, %c0_5, %c0_6] : memref<2x4x256xf32, #tpu.memory_space<vmem>>, vector<2x4x256xf32>
    %cst_7 = arith.constant 0.000000e+00 : f32
    %15 = vector.broadcast %cst_7 : f32 to vector<2x4x256xf32>
    %16 = arith.select %10, %14, %15 : vector<2x4x256xi1>, vector<2x4x256xf32>
    %c0_8 = arith.constant 0 : index
    %c0_9 = arith.constant 0 : index
    %c0_10 = arith.constant 0 : index
    %17 = vector.load %arg4[%c0_8, %c0_9, %c0_10] : memref<1x2x4xf32, #tpu.memory_space<vmem>>, vector<1x2x4xf32>
    %cst_11 = arith.constant dense<0.000000e+00> : vector<2x4xf32>
    %18 = vector.multi_reduction <add>, %13, %cst_11 [2] : vector<2x4x256xf32> to vector<2x4xf32>
    %19 = vector.shape_cast %18 : vector<2x4xf32> to vector<1x2x4xf32>
    %20 = arith.addf %17, %19 : vector<1x2x4xf32>
    %c0_12 = arith.constant 0 : index
    %c0_13 = arith.constant 0 : index
    %c0_14 = arith.constant 0 : index
    %21 = vector.load %arg4[%c0_12, %c0_13, %c0_14] : memref<1x2x4xf32, #tpu.memory_space<vmem>>, vector<1x2x4xf32>
    tpu.vector_store %arg4[%c0_12, %c0_13, %c0_14], %20 {strides = array<i32>} : memref<1x2x4xf32, #tpu.memory_space<vmem>>, vector<1x2x4xf32>,
    %c0_15 = arith.constant 0 : index
    %c0_16 = arith.constant 0 : index
    %c0_17 = arith.constant 0 : index
    %22 = vector.load %arg5[%c0_15, %c0_16, %c0_17] : memref<1x2x4xf32, #tpu.memory_space<vmem>>, vector<1x2x4xf32>
    %cst_18 = arith.constant dense<0.000000e+00> : vector<2x4xf32>
    %23 = vector.multi_reduction <add>, %16, %cst_18 [2] : vector<2x4x256xf32> to vector<2x4xf32>
    %24 = vector.shape_cast %23 : vector<2x4xf32> to vector<1x2x4xf32>
    %25 = arith.addf %22, %24 : vector<1x2x4xf32>
    %c0_19 = arith.constant 0 : index
    %c0_20 = arith.constant 0 : index
    %c0_21 = arith.constant 0 : index
    %26 = vector.load %arg5[%c0_19, %c0_20, %c0_21] : memref<1x2x4xf32, #tpu.memory_space<vmem>>, vector<1x2x4xf32>
    tpu.vector_store %arg5[%c0_19, %c0_20, %c0_21], %25 {strides = array<i32>} : memref<1x2x4xf32, #tpu.memory_space<vmem>>, vector<1x2x4xf32>,
    return
  }
  func.func @transform_0(%arg0: i32, %arg1: i32) -> (i32, i32, i32) {
    %c1_i32 = arith.constant 1 : i32
    %0 = arith.muli %arg0, %c1_i32 : i32
    %1 = arith.addi %0, %arg1 : i32
    %c0_i32 = arith.constant 0 : i32
    %2 = arith.minsi %1, %c0_i32 : i32
    %c0_i32_0 = arith.constant 0 : i32
    %c0_i32_1 = arith.constant 0 : i32
    %c0_i32_2 = arith.constant 0 : i32
    return %c0_i32_0, %c0_i32_1, %2 : i32, i32, i32
  }
  func.func @transform_1(%arg0: i32, %arg1: i32) -> (i32, i32, i32) {
    %c1_i32 = arith.constant 1 : i32
    %0 = arith.muli %arg0, %c1_i32 : i32
    %1 = arith.addi %0, %arg1 : i32
    %c0_i32 = arith.constant 0 : i32
    %2 = arith.minsi %1, %c0_i32 : i32
    %c0_i32_0 = arith.constant 0 : i32
    %c0_i32_1 = arith.constant 0 : i32
    %c0_i32_2 = arith.constant 0 : i32
    return %c0_i32_0, %c0_i32_1, %2 : i32, i32, i32
  }
  func.func @transform_2(%arg0: i32, %arg1: i32) -> (i32, i32, i32) {
    %c0_i32 = arith.constant 0 : i32
    %c0_i32_0 = arith.constant 0 : i32
    %c0_i32_1 = arith.constant 0 : i32
    return %arg0, %c0_i32, %c0_i32_0 : i32, i32, i32
  }
  func.func @transform_3(%arg0: i32, %arg1: i32) -> (i32, i32, i32) {
    %c0_i32 = arith.constant 0 : i32
    %c0_i32_0 = arith.constant 0 : i32
    %c0_i32_1 = arith.constant 0 : i32
    return %arg0, %c0_i32, %c0_i32_0 : i32, i32, i32
  }
}

</mosaic_0001>

<bundles_post_ra>
// kernel: tpu_custom_call.1
= control target key start
LH: loop header
LB: loop body
LE: loop exit
PB: predicated region body
PF: predicated region fallthrough
CT: control target
= control target key end

     0   :  { %9 = vsyncpa [#allocation3], 0  ;;  %s365_s0 = inlined_call_operand.hbm [shape: f32[2,4,256], index: 0, kind: input, shape index: {}]   ;;  %s366_s1 = inlined_call_operand.hbm [shape: f32[2,4,256], index: 1, kind: input, shape index: {}]   ;;  %s367_s2 = inlined_call_operand.hbm [shape: f32[1,2,4], index: 2, kind: output, shape index: {0}]   ;;  %s368_s3 = inlined_call_operand.hbm [shape: f32[1,2,4], index: 3, kind: output, shape index: {1}]  }
   0x1   :  { %10 = vsyncpa [#allocation6], 0 }
   0x2   :  { %11 = vsyncpa [#allocation4], 0 }
   0x3   :  { %12 = vsyncpa [#allocation9], 0  ;;  %s23_s14 = sshll.u32 %s365_s0, 4  ;;  %s312_s15 = smov [#allocation2]   ;;  %s24_s14 = int_to_ptr.hbm [resolvable:$true] %s23_s14 }
   0x4   :  { %s25_s16 = sshll.u32 %s312_s15, 4  ;;  %s42_s19 = sshll.u32 %s366_s1, 4  ;;  %s26_s16 = int_to_ptr.vmem [resolvable:$true] %s25_s16  ;;  %s43_s19 = int_to_ptr.hbm [resolvable:$true] %s42_s19 }
   0x5   :  { %s313_s20 = smov 128   ;;  %s314_s21 = smov 8  }
   0x6   :  { %31 = dma.hbm_to_vmem [thread:$0]  %s24_s14, 256, %s26_s16, [#allocation3], %s313_s20, %s313_s20, %s314_s21  }
   0x7   :  { %s315_s22 = smov [#allocation5]  }
   0x8   :  { %s44_s23 = sshll.u32 %s315_s22, 4  ;;  %s45_s23 = int_to_ptr.vmem [resolvable:$true] %s44_s23 }
   0x9   :  { %50 = dma.hbm_to_vmem [thread:$0]  %s43_s19, 256, %s45_s23, [#allocation6], %s313_s20, %s313_s20, %s314_s21  }
   0xa   :  { %304 = dma.done.wait [#allocation3], 256  }
   0xb   :  { %305 = vsyncadd [#allocation3], 4294967040 }
   0xc   :  { %306 = dma.done.wait [#allocation6], 256  }
   0xd   :  { %307 = vsyncadd [#allocation6], 4294967040  ;;  %v84_v0 = vld [vmem:[#allocation2] sm:$0xff]  ;;  %v85_v1 = vld [vmem:[#allocation2 + $0x8] sm:$0xff]  ;;  %vm123_vm0 = vcmask 1043456   ;;  %vm71_vm1 = vcmask 25600   ;;  %v76_v25 = vlaneseq }
   0xe   :  { %88 = vst [vmem:[#allocation1] ss:$2 sm:$0xff] %v84_v0  ;;  %v103_v2 = vld [vmem:[#allocation5] sm:$0xff]  ;;  %v104_v3 = vld [vmem:[#allocation5 + $0x8] sm:$0xff]  ;;  %v316_v24 = vmov 0.0   ;;  %vm138_vm2 = vcmask 1041409  }
   0xf   :  { %92 = vst [vmem:[#allocation1 + $0x10] ss:$2 sm:$0xff] %v85_v1  ;;  %v77_v27 = vand.u32 127, %v76_v25  ;;  %s317_s0 = smov [#allocation7]   ;;  %s170_s26 = sshll.u32 %s367_s2, 4  ;;  %s171_s26 = int_to_ptr.hbm [resolvable:$true] %s170_s26 }
  0x10   :  { %72 = vst.msk [vmem:[#allocation7] sm:$0x3] %vm71_vm1, %v316_v24  ;;  %s168_s1 = sshll.u32 %s317_s0, 4  ;;  %s318_s27 = smov [#allocation8]   ;;  %s169_s1 = int_to_ptr.vmem [resolvable:$true] %s168_s1 }
  0x11   :  { %73 = vst.msk [vmem:[#allocation8] sm:$0x3] %vm71_vm1, %v316_v24  ;;  %s179_s28 = sshll.u32 %s318_s27, 4  ;;  %s181_s4 = sshll.u32 %s368_s3, 4  ;;  %s180_s28 = int_to_ptr.vmem [resolvable:$true] %s179_s28  ;;  %s182_s4 = int_to_ptr.hbm [resolvable:$true] %s181_s4 }
  0x15   :  { %v89_v4 = vld.sshfl [vmem:[#allocation1] sm:$0xff pattern:$0x75316420]  ;;  %v90_v5 = vld.sshfl [vmem:[#allocation1 + $0x8] sm:$0xff pattern:$0x75316420] }
  0x16   :  { %v124_v6 = vsel %vm123_vm0, %v89_v4, 0.0  ;;  %v125_v7 = vsel %vm123_vm0, %v90_v5, 0.0  ;;  %107 = vst [vmem:[#allocation1] ss:$2 sm:$0xff] %v103_v2 }
  0x17   :  { %v126_v8 = vadd.f32 %v125_v7, %v124_v6  ;;  %v93_v9 = vld.sshfl [vmem:[#allocation1 + $0x10] sm:$0xff pattern:$0x75316420]  ;;  %v94_v10 = vld.sshfl [vmem:[#allocation1 + $0x18] sm:$0xff pattern:$0x75316420] }
  0x18   :  { %111 = vst [vmem:[#allocation1 + $0x10] ss:$2 sm:$0xff] %v104_v3  ;;  %v129_v11 = vsel %vm123_vm0, %v93_v9, 0.0  ;;  %v130_v12 = vsel %vm123_vm0, %v94_v10, 0.0  ;;  %v122_v31 = vld [vmem:[#allocation7] sm:$0x3] }
  0x19   :  { %127 = vadd.xlane.f32.xlu0 %v126_v8  ;;  %v131_v13 = vadd.f32 %v130_v12, %v129_v11  ;;  %v144_v37 = vld [vmem:[#allocation8] sm:$0x3] }
  0x1d   :  { %v108_v14 = vld.sshfl [vmem:[#allocation1] sm:$0xff pattern:$0x75316420]  ;;  %v109_v15 = vld.sshfl [vmem:[#allocation1 + $0x8] sm:$0xff pattern:$0x75316420] }
  0x1e   :  { %v145_v16 = vsel %vm123_vm0, %v108_v14, 0.0  ;;  %v146_v17 = vsel %vm123_vm0, %v109_v15, 0.0 }
  0x1f   :  { %v147_v18 = vadd.f32 %v146_v17, %v145_v16  ;;  %v112_v19 = vld.sshfl [vmem:[#allocation1 + $0x10] sm:$0xff pattern:$0x75316420]  ;;  %v113_v20 = vld.sshfl [vmem:[#allocation1 + $0x18] sm:$0xff pattern:$0x75316420] }
  0x20   :  { %v150_v21 = vsel %vm123_vm0, %v112_v19, 0.0  ;;  %v151_v22 = vsel %vm123_vm0, %v113_v20, 0.0 }
  0x21   :  { %132 = vadd.xlane.f32.xlu0 %v131_v13  ;;  %148 = vadd.xlane.f32.xlu1 %v147_v18  ;;  %v152_v23 = vadd.f32 %v151_v22, %v150_v21 }
  0x29   :  { %153 = vadd.xlane.f32.xlu1 %v152_v23 }
  0x8c   :  { %v128_v26 = vpop.xlane.xlu0 %127 }
  0x8d   :  { %v136_v28 = vperm.slane %v128_v26, %v77_v27 }
  0x94   :  { %v133_v29 = vpop.xlane.xlu0 %132  ;;  %v149_v30 = vpop.xlane.xlu1 %148 }
  0x95   :  { %v137_v32 = vperm.slane %v133_v29, %v77_v27  ;;  %v157_v36 = vperm.slane %v149_v30, %v77_v27 }
  0x97   :  { %v139_v33 = vsel %vm138_vm2, %v137_v32, %v136_v28 }
  0x98   :  { %v141_v34 = vadd.f32 %v139_v33, %v122_v31 }
  0x9a   :  { %143 = vst.msk [vmem:[#allocation7] sm:$0x3] %vm71_vm1, %v141_v34 }
  0x9b   :  { %173 = dma.vmem_to_hbm [thread:$0]  %s169_s1, 32, %s171_s26, [#allocation4]  }
  0x9c   :  { %v154_v35 = vpop.xlane.xlu1 %153 }
  0x9d   :  { %v158_v38 = vperm.slane %v154_v35, %v77_v27 }
  0x9f   :  { %v159_v39 = vsel %vm138_vm2, %v158_v38, %v157_v36 }
  0xa0   :  { %v161_v40 = vadd.f32 %v159_v39, %v144_v37 }
  0xa2   :  { %162 = vst.msk [vmem:[#allocation8] sm:$0x3] %vm71_vm1, %v161_v40 }
  0xa3   :  { %184 = dma.vmem_to_hbm [thread:$0]  %s180_s28, 32, %s182_s4, [#allocation9]  }
  0xa4   :  { %308 = dma.done.wait [#allocation4], 32  }
  0xa5   :  { %309 = vsyncadd [#allocation4], 4294967264 }
  0xa6   :  { %310 = dma.done.wait [#allocation9], 32  }
  0xa7   :  { %311 = vsyncadd [#allocation9], 4294967264 }
  0xa8   :  { %193 = vsyncpa [#allocation3], 1 }
  0xa9   :  { %194 = vsyncpa [#allocation6], 1 }
  0xaa   :  { %195 = vsyncpa [#allocation4], 1 }
  0xab   :  { %196 = vsyncpa [#allocation9], 1 }

</bundles_post_ra>
